<compile_context>
chip_gen: v6e
topology: v6e:2x2x1
jax: 0.10.0
libtpu: 0.0.40
codegen_flags: <defaults>
</compile_context>

<pallas_src>
from functools import partial

import jax
import jax.numpy as jnp
from jax import lax
from jax.experimental import pallas as pl
from jax.experimental.pallas import tpu as pltpu

LANES = 128
SUBLANES = 8                       # f32 vreg sublanes: accumulation granularity
MAX_TILE_BYTES_PER_BUFFER = 4 << 20  # ~4 MiB/input/buffer -> per-step overhead <~10%


def _round_up(a, b):
    return ((a + b - 1) // b) * b


def _pearson_moments_kernel(
    x_ref, y_ref, out_ref,
    sx_ref, sy_ref, sxy_ref, sxx_ref, syy_ref,
    *, n_valid, valid_rows_last, ragged, epsilon,
):
    i = pl.program_id(0)
    last = pl.num_programs(0) - 1
    tile_rows = x_ref.shape[0]

    @pl.when(i == 0)
    def _init():
        for ref in (sx_ref, sy_ref, sxy_ref, sxx_ref, syy_ref):
            ref[...] = jnp.zeros_like(ref)

    def _accumulate(num_rows):
        # Accumulate the first `num_rows` (static) rows of this tile into the
        # five resident (8,128) partial-moment scratch buffers.  Rows beyond
        # `num_rows` (OOB / unspecified block contents) are zero-masked BEFORE
        # any product, so they contribute nothing and cannot inject NaNs.
        num_chunks = pl.cdiv(num_rows, SUBLANES)
        need_mask = (num_rows % SUBLANES) != 0
        if need_mask:
            row_iota = lax.broadcasted_iota(jnp.int32, (SUBLANES, LANES), 0)

        def body(c, carry):
            sx, sy, sxy, sxx, syy = carry
            r0 = pl.multiple_of(c * SUBLANES, SUBLANES)
            x = x_ref[pl.ds(r0, SUBLANES), :].astype(jnp.float32)
            y = y_ref[pl.ds(r0, SUBLANES), :].astype(jnp.float32)
            if need_mask:
                m = row_iota < (num_rows - c * SUBLANES)
                x = jnp.where(m, x, 0.0)
                y = jnp.where(m, y, 0.0)
            return (sx + x, sy + y, sxy + x * y, sxx + x * x, syy + y * y)

        zeros = jnp.zeros((SUBLANES, LANES), jnp.float32)
        init = (zeros, zeros, zeros, zeros, zeros)
        sx, sy, sxy, sxx, syy = lax.fori_loop(
            0, num_chunks, body, init, unroll=max(1, min(8, num_chunks)))
        sx_ref[...] += sx
        sy_ref[...] += sy
        sxy_ref[...] += sxy
        sxx_ref[...] += sxx
        syy_ref[...] += syy

    if ragged:
        # Hot loop (all full tiles) stays completely mask-free.
        @pl.when(i < last)
        def _main():
            _accumulate(tile_rows)

        @pl.when(i == last)
        def _tail():
            _accumulate(valid_rows_last)
    else:
        _accumulate(tile_rows)

    @pl.when(i == last)
    def _finalize():
        n = jnp.float32(n_valid)
        sx = jnp.sum(sx_ref[...])
        sy = jnp.sum(sy_ref[...])
        sxy = jnp.sum(sxy_ref[...])
        sxx = jnp.sum(sxx_ref[...])
        syy = jnp.sum(syy_ref[...])

        mean_x = sx / n
        mean_y = sy / n
        # Raw-moment form of the centered sums; clamp variances at 0 so f32
        # cancellation can never feed sqrt a negative value.
        r_num = sxy - n * mean_x * mean_y
        var_x = jnp.maximum(sxx - n * mean_x * mean_x, 0.0)
        var_y = jnp.maximum(syy - n * mean_y * mean_y, 0.0)
        r_den = jnp.sqrt(var_x + epsilon) * jnp.sqrt(var_y + epsilon)
        r = jnp.clip(r_num / r_den, -1.0, 1.0)
        out_ref[0, 0] = 1.0 - r


def pearson_r_loss(output, target, epsilon=1e-8):
    """Pallas implementation of PearsonRLoss.forward (returns scalar f32)."""
    assert output.shape == target.shape, "output/target must have the same shape"
    n = output.size
    assert n > 0

    x = output.reshape(-1)
    y = target.reshape(-1)

    itemsize = int(jnp.dtype(output.dtype).itemsize)
    # Sub-32-bit dtypes pack along sublanes: minimum dense block rows.
    pack = max(SUBLANES, 32 // max(1, itemsize))      # 8 f32 / 16 bf16 / 32 int8

    rem = n % LANES
    if rem:
        # Only a sub-128-element lane tail is padded (zeros contribute 0 to
        # every raw-moment sum).
        # TODO(synk): for very large non-128-aligned tensors this is still a
        # full XLA copy; compute the <128-element tail's moments in plain JAX
        # and fold them into the finalize instead.
        x = jnp.pad(x, (0, LANES - rem))
        y = jnp.pad(y, (0, LANES - rem))
    rows = pl.cdiv(n, LANES)
    x = x.reshape(rows, LANES)   # free bitcast when no pad was needed
    y = y.reshape(rows, LANES)

    # ~4 MiB per input per pipeline buffer, dtype-aware, rounded to the
    # native sublane pack.
    max_tile_rows = max(
        pack, (MAX_TILE_BYTES_PER_BUFFER // (LANES * itemsize)) // pack * pack)
    tile_rows = min(max_tile_rows, _round_up(rows, pack))
    nblocks = pl.cdiv(rows, tile_rows)
    valid_rows_last = rows - (nblocks - 1) * tile_rows
    ragged = valid_rows_last != tile_rows

    # 2 inputs x 2 pipeline buffers x block, plus headroom; cap for v7x (64 MiB).
    block_bytes = tile_rows * LANES * itemsize
    vmem_limit = int(min(48 << 20, max(16 << 20, 4 * block_bytes + (4 << 20))))

    kernel = partial(
        _pearson_moments_kernel,
        n_valid=n,
        valid_rows_last=valid_rows_last,
        ragged=ragged,
        epsilon=epsilon,
    )

    out = pl.pallas_call(
        kernel,
        out_shape=jax.ShapeDtypeStruct((1, 1), jnp.float32),
        grid_spec=pltpu.PrefetchScalarGridSpec(
            num_scalar_prefetch=0,
            grid=(nblocks,),
            in_specs=[
                pl.BlockSpec((tile_rows, LANES), lambda i: (i, 0)),
                pl.BlockSpec((tile_rows, LANES), lambda i: (i, 0)),
            ],
            out_specs=pl.BlockSpec(memory_space=pltpu.MemorySpace.SMEM),
            scratch_shapes=[pltpu.VMEM((SUBLANES, LANES), jnp.float32)
                            for _ in range(5)],
        ),
        compiler_params=pltpu.CompilerParams(
            dimension_semantics=("arbitrary",),  # resident accumulators across grid
            vmem_limit_bytes=vmem_limit,
        ),
    )(x, y)
    return out[0, 0]


def _pearson_r_loss_ref(output, target, epsilon=1e-8):
    """Pure-JAX reference mirroring the PyTorch module."""
    x = output.astype(jnp.float32).reshape(-1)
    y = target.astype(jnp.float32).reshape(-1)
    xm = x - jnp.mean(x)
    ym = y - jnp.mean(y)
    r_num = jnp.sum(xm * ym)
    r_den = jnp.sqrt(jnp.sum(xm * xm) + epsilon) * jnp.sqrt(jnp.sum(ym * ym) + epsilon)
    r = jnp.clip(r_num / r_den, -1.0, 1.0)
    return 1.0 - r


if __name__ == "__main__":
    key = jax.random.PRNGKey(0)

    # 1) NCHW-like shape (lane-aligned path, no padding, no masking).
    k1, k2, k3, k4 = jax.random.split(key, 4)
    shape = (2, 4, 16, 16)
    output = jax.random.normal(k1, shape, dtype=jnp.float32)
    target = 0.7 * output + 0.3 * jax.random.normal(k2, shape, dtype=jnp.float32)

    loss = jax.block_until_ready(pearson_r_loss(output, target))
    ref = _pearson_r_loss_ref(output, target)
    assert jnp.allclose(loss, ref, atol=1e-5, rtol=1e-5), (loss, ref)

    # 2) Non-128-aligned size (exercises lane-tail pad + in-kernel row mask).
    shape2 = (3, 5, 7)
    out2 = jax.random.normal(k3, shape2, dtype=jnp.float32)
    tgt2 = 0.5 * out2 + 0.5 * jax.random.normal(k4, shape2, dtype=jnp.float32)

    loss2 = jax.block_until_ready(pearson_r_loss(out2, tgt2))
    ref2 = _pearson_r_loss_ref(out2, tgt2)
    assert jnp.allclose(loss2, ref2, atol=1e-5, rtol=1e-5), (loss2, ref2)

    print("KERNEL_OK")
</pallas_src>

<mosaic_0001>
module attributes {stable_mosaic.version = 11 : i64} {
  func.func @_pearson_moments_kernel(%arg0: i32, %arg1: memref<16x128xf32, #tpu.memory_space<vmem>>, %arg2: memref<16x128xf32, #tpu.memory_space<vmem>>, %arg3: memref<1x1xf32, #tpu.memory_space<smem>>, %arg4: memref<8x128xf32, #tpu.memory_space<vmem>>, %arg5: memref<8x128xf32, #tpu.memory_space<vmem>>, %arg6: memref<8x128xf32, #tpu.memory_space<vmem>>, %arg7: memref<8x128xf32, #tpu.memory_space<vmem>>, %arg8: memref<8x128xf32, #tpu.memory_space<vmem>>) attributes {dimension_semantics = [#tpu.dimension_semantics<arbitrary>], iteration_bounds = array<i64: 1>, scalar_prefetch = 0 : i64, scratch_operands = 5 : i64, tpu.core_type = #tpu.core_type<tc>, window_params = [{transform_indices = @transform_0, window_bounds = array<i64: 16, 128>}, {transform_indices = @transform_1, window_bounds = array<i64: 16, 128>}, {transform_indices = @transform_2, window_bounds = array<i64: 1, 1>}]} {
    %c0_i32 = arith.constant 0 : i32
    %0 = arith.cmpi eq, %arg0, %c0_i32 : i32
    %1 = arith.extui %0 : i1 to i32
    %c0_i32_0 = arith.constant 0 : i32
    %2 = arith.cmpi ne, %1, %c0_i32_0 : i32
    scf.if %2 {
      %cst_28 = arith.constant 0.000000e+00 : f32
      %50 = vector.broadcast %cst_28 : f32 to vector<8x128xf32>
      %c0_29 = arith.constant 0 : index
      %c0_30 = arith.constant 0 : index
      %51 = vector.load %arg4[%c0_29, %c0_30] : memref<8x128xf32, #tpu.memory_space<vmem>>, vector<8x128xf32>
      tpu.vector_store %arg4[%c0_29, %c0_30], %50 {strides = array<i32>} : memref<8x128xf32, #tpu.memory_space<vmem>>, vector<8x128xf32>,
      %cst_31 = arith.constant 0.000000e+00 : f32
      %52 = vector.broadcast %cst_31 : f32 to vector<8x128xf32>
      %c0_32 = arith.constant 0 : index
      %c0_33 = arith.constant 0 : index
      %53 = vector.load %arg5[%c0_32, %c0_33] : memref<8x128xf32, #tpu.memory_space<vmem>>, vector<8x128xf32>
      tpu.vector_store %arg5[%c0_32, %c0_33], %52 {strides = array<i32>} : memref<8x128xf32, #tpu.memory_space<vmem>>, vector<8x128xf32>,
      %cst_34 = arith.constant 0.000000e+00 : f32
      %54 = vector.broadcast %cst_34 : f32 to vector<8x128xf32>
      %c0_35 = arith.constant 0 : index
      %c0_36 = arith.constant 0 : index
      %55 = vector.load %arg6[%c0_35, %c0_36] : memref<8x128xf32, #tpu.memory_space<vmem>>, vector<8x128xf32>
      tpu.vector_store %arg6[%c0_35, %c0_36], %54 {strides = array<i32>} : memref<8x128xf32, #tpu.memory_space<vmem>>, vector<8x128xf32>,
      %cst_37 = arith.constant 0.000000e+00 : f32
      %56 = vector.broadcast %cst_37 : f32 to vector<8x128xf32>
      %c0_38 = arith.constant 0 : index
      %c0_39 = arith.constant 0 : index
      %57 = vector.load %arg7[%c0_38, %c0_39] : memref<8x128xf32, #tpu.memory_space<vmem>>, vector<8x128xf32>
      tpu.vector_store %arg7[%c0_38, %c0_39], %56 {strides = array<i32>} : memref<8x128xf32, #tpu.memory_space<vmem>>, vector<8x128xf32>,
      %cst_40 = arith.constant 0.000000e+00 : f32
      %58 = vector.broadcast %cst_40 : f32 to vector<8x128xf32>
      %c0_41 = arith.constant 0 : index
      %c0_42 = arith.constant 0 : index
      %59 = vector.load %arg8[%c0_41, %c0_42] : memref<8x128xf32, #tpu.memory_space<vmem>>, vector<8x128xf32>
      tpu.vector_store %arg8[%c0_41, %c0_42], %58 {strides = array<i32>} : memref<8x128xf32, #tpu.memory_space<vmem>>, vector<8x128xf32>,
    } else {
    }
    %cst = arith.constant 0.000000e+00 : f32
    %3 = vector.broadcast %cst : f32 to vector<8x128xf32>
    %c0_i32_1 = arith.constant 0 : i32
    %c8_i32 = arith.constant 8 : i32
    %4 = arith.muli %c0_i32_1, %c8_i32 : i32
    %5 = tpu.assume_multiple %4, 8 : i32
    %6 = arith.index_cast %5 : i32 to index
    %c0 = arith.constant 0 : index
    %7 = vector.load %arg1[%6, %c0] : memref<16x128xf32, #tpu.memory_space<vmem>>, vector<8x128xf32>
    %8 = arith.index_cast %5 : i32 to index
    %c0_2 = arith.constant 0 : index
    %9 = vector.load %arg2[%8, %c0_2] : memref<16x128xf32, #tpu.memory_space<vmem>>, vector<8x128xf32>
    %10 = arith.addf %3, %7 : vector<8x128xf32>
    %11 = arith.addf %3, %9 : vector<8x128xf32>
    %12 = arith.mulf %7, %9 : vector<8x128xf32>
    %13 = arith.addf %3, %12 : vector<8x128xf32>
    %14 = arith.mulf %7, %7 : vector<8x128xf32>
    %15 = arith.addf %3, %14 : vector<8x128xf32>
    %16 = arith.mulf %9, %9 : vector<8x128xf32>
    %17 = arith.addf %3, %16 : vector<8x128xf32>
    %c1_i32 = arith.constant 1 : i32
    %c8_i32_3 = arith.constant 8 : i32
    %18 = arith.muli %c1_i32, %c8_i32_3 : i32
    %19 = tpu.assume_multiple %18, 8 : i32
    %20 = arith.index_cast %19 : i32 to index
    %c0_4 = arith.constant 0 : index
    %21 = vector.load %arg1[%20, %c0_4] : memref<16x128xf32, #tpu.memory_space<vmem>>, vector<8x128xf32>
    %22 = arith.index_cast %19 : i32 to index
    %c0_5 = arith.constant 0 : index
    %23 = vector.load %arg2[%22, %c0_5] : memref<16x128xf32, #tpu.memory_space<vmem>>, vector<8x128xf32>
    %24 = arith.addf %10, %21 : vector<8x128xf32>
    %25 = arith.addf %11, %23 : vector<8x128xf32>
    %26 = arith.mulf %21, %23 : vector<8x128xf32>
    %27 = arith.addf %13, %26 : vector<8x128xf32>
    %28 = arith.mulf %21, %21 : vector<8x128xf32>
    %29 = arith.addf %15, %28 : vector<8x128xf32>
    %30 = arith.mulf %23, %23 : vector<8x128xf32>
    %31 = arith.addf %17, %30 : vector<8x128xf32>
    %c2_i32 = arith.constant 2 : i32
    %c0_6 = arith.constant 0 : index
    %c0_7 = arith.constant 0 : index
    %32 = vector.load %arg4[%c0_6, %c0_7] : memref<8x128xf32, #tpu.memory_space<vmem>>, vector<8x128xf32>
    %33 = arith.addf %32, %24 : vector<8x128xf32>
    %c0_8 = arith.constant 0 : index
    %c0_9 = arith.constant 0 : index
    %34 = vector.load %arg4[%c0_8, %c0_9] : memref<8x128xf32, #tpu.memory_space<vmem>>, vector<8x128xf32>
    tpu.vector_store %arg4[%c0_8, %c0_9], %33 {strides = array<i32>} : memref<8x128xf32, #tpu.memory_space<vmem>>, vector<8x128xf32>,
    %c0_10 = arith.constant 0 : index
    %c0_11 = arith.constant 0 : index
    %35 = vector.load %arg5[%c0_10, %c0_11] : memref<8x128xf32, #tpu.memory_space<vmem>>, vector<8x128xf32>
    %36 = arith.addf %35, %25 : vector<8x128xf32>
    %c0_12 = arith.constant 0 : index
    %c0_13 = arith.constant 0 : index
    %37 = vector.load %arg5[%c0_12, %c0_13] : memref<8x128xf32, #tpu.memory_space<vmem>>, vector<8x128xf32>
    tpu.vector_store %arg5[%c0_12, %c0_13], %36 {strides = array<i32>} : memref<8x128xf32, #tpu.memory_space<vmem>>, vector<8x128xf32>,
    %c0_14 = arith.constant 0 : index
    %c0_15 = arith.constant 0 : index
    %38 = vector.load %arg6[%c0_14, %c0_15] : memref<8x128xf32, #tpu.memory_space<vmem>>, vector<8x128xf32>
    %39 = arith.addf %38, %27 : vector<8x128xf32>
    %c0_16 = arith.constant 0 : index
    %c0_17 = arith.constant 0 : index
    %40 = vector.load %arg6[%c0_16, %c0_17] : memref<8x128xf32, #tpu.memory_space<vmem>>, vector<8x128xf32>
    tpu.vector_store %arg6[%c0_16, %c0_17], %39 {strides = array<i32>} : memref<8x128xf32, #tpu.memory_space<vmem>>, vector<8x128xf32>,
    %c0_18 = arith.constant 0 : index
    %c0_19 = arith.constant 0 : index
    %41 = vector.load %arg7[%c0_18, %c0_19] : memref<8x128xf32, #tpu.memory_space<vmem>>, vector<8x128xf32>
    %42 = arith.addf %41, %29 : vector<8x128xf32>
    %c0_20 = arith.constant 0 : index
    %c0_21 = arith.constant 0 : index
    %43 = vector.load %arg7[%c0_20, %c0_21] : memref<8x128xf32, #tpu.memory_space<vmem>>, vector<8x128xf32>
    tpu.vector_store %arg7[%c0_20, %c0_21], %42 {strides = array<i32>} : memref<8x128xf32, #tpu.memory_space<vmem>>, vector<8x128xf32>,
    %c0_22 = arith.constant 0 : index
    %c0_23 = arith.constant 0 : index
    %44 = vector.load %arg8[%c0_22, %c0_23] : memref<8x128xf32, #tpu.memory_space<vmem>>, vector<8x128xf32>
    %45 = arith.addf %44, %31 : vector<8x128xf32>
    %c0_24 = arith.constant 0 : index
    %c0_25 = arith.constant 0 : index
    %46 = vector.load %arg8[%c0_24, %c0_25] : memref<8x128xf32, #tpu.memory_space<vmem>>, vector<8x128xf32>
    tpu.vector_store %arg8[%c0_24, %c0_25], %45 {strides = array<i32>} : memref<8x128xf32, #tpu.memory_space<vmem>>, vector<8x128xf32>,
    %c0_i32_26 = arith.constant 0 : i32
    %47 = arith.cmpi eq, %arg0, %c0_i32_26 : i32
    %48 = arith.extui %47 : i1 to i32
    %c0_i32_27 = arith.constant 0 : i32
    %49 = arith.cmpi ne, %48, %c0_i32_27 : i32
    scf.if %49 {
      %c0_28 = arith.constant 0 : index
      %c0_29 = arith.constant 0 : index
      %50 = vector.load %arg4[%c0_28, %c0_29] : memref<8x128xf32, #tpu.memory_space<vmem>>, vector<8x128xf32>
      %51 = vector.shape_cast %50 : vector<8x128xf32> to vector<1x8x128xf32>
      %cst_30 = arith.constant dense<0.000000e+00> : vector<1xf32>
      %52 = vector.multi_reduction <add>, %51, %cst_30 [1, 2] : vector<1x8x128xf32> to vector<1xf32>
      %53 = vector.shape_cast %52 : vector<1xf32> to vector<1x1x1xf32>
      %54 = vector.extract %53[0, 0, 0] : f32 from vector<1x1x1xf32>
      %c0_31 = arith.constant 0 : index
      %c0_32 = arith.constant 0 : index
      %55 = vector.load %arg5[%c0_31, %c0_32] : memref<8x128xf32, #tpu.memory_space<vmem>>, vector<8x128xf32>
      %56 = vector.shape_cast %55 : vector<8x128xf32> to vector<1x8x128xf32>
      %cst_33 = arith.constant dense<0.000000e+00> : vector<1xf32>
      %57 = vector.multi_reduction <add>, %56, %cst_33 [1, 2] : vector<1x8x128xf32> to vector<1xf32>
      %58 = vector.shape_cast %57 : vector<1xf32> to vector<1x1x1xf32>
      %59 = vector.extract %58[0, 0, 0] : f32 from vector<1x1x1xf32>
      %c0_34 = arith.constant 0 : index
      %c0_35 = arith.constant 0 : index
      %60 = vector.load %arg6[%c0_34, %c0_35] : memref<8x128xf32, #tpu.memory_space<vmem>>, vector<8x128xf32>
      %61 = vector.shape_cast %60 : vector<8x128xf32> to vector<1x8x128xf32>
      %cst_36 = arith.constant dense<0.000000e+00> : vector<1xf32>
      %62 = vector.multi_reduction <add>, %61, %cst_36 [1, 2] : vector<1x8x128xf32> to vector<1xf32>
      %63 = vector.shape_cast %62 : vector<1xf32> to vector<1x1x1xf32>
      %64 = vector.extract %63[0, 0, 0] : f32 from vector<1x1x1xf32>
      %c0_37 = arith.constant 0 : index
      %c0_38 = arith.constant 0 : index
      %65 = vector.load %arg7[%c0_37, %c0_38] : memref<8x128xf32, #tpu.memory_space<vmem>>, vector<8x128xf32>
      %66 = vector.shape_cast %65 : vector<8x128xf32> to vector<1x8x128xf32>
      %cst_39 = arith.constant dense<0.000000e+00> : vector<1xf32>
      %67 = vector.multi_reduction <add>, %66, %cst_39 [1, 2] : vector<1x8x128xf32> to vector<1xf32>
      %68 = vector.shape_cast %67 : vector<1xf32> to vector<1x1x1xf32>
      %69 = vector.extract %68[0, 0, 0] : f32 from vector<1x1x1xf32>
      %c0_40 = arith.constant 0 : index
      %c0_41 = arith.constant 0 : index
      %70 = vector.load %arg8[%c0_40, %c0_41] : memref<8x128xf32, #tpu.memory_space<vmem>>, vector<8x128xf32>
      %71 = vector.shape_cast %70 : vector<8x128xf32> to vector<1x8x128xf32>
      %cst_42 = arith.constant dense<0.000000e+00> : vector<1xf32>
      %72 = vector.multi_reduction <add>, %71, %cst_42 [1, 2] : vector<1x8x128xf32> to vector<1xf32>
      %73 = vector.shape_cast %72 : vector<1xf32> to vector<1x1x1xf32>
      %74 = vector.extract %73[0, 0, 0] : f32 from vector<1x1x1xf32>
      %cst_43 = arith.constant 2.048000e+03 : f32
      %75 = arith.divf %54, %cst_43 : f32
      %cst_44 = arith.constant 2.048000e+03 : f32
      %76 = arith.divf %59, %cst_44 : f32
      %cst_45 = arith.constant 2.048000e+03 : f32
      %77 = arith.mulf %cst_45, %75 : f32
      %78 = arith.mulf %77, %76 : f32
      %79 = arith.subf %64, %78 : f32
      %cst_46 = arith.constant 2.048000e+03 : f32
      %80 = arith.mulf %cst_46, %75 : f32
      %81 = arith.mulf %80, %75 : f32
      %82 = arith.subf %69, %81 : f32
      %cst_47 = arith.constant 0.000000e+00 : f32
      %83 = arith.maximumf %82, %cst_47 : f32
      %cst_48 = arith.constant 2.048000e+03 : f32
      %84 = arith.mulf %cst_48, %76 : f32
      %85 = arith.mulf %84, %76 : f32
      %86 = arith.subf %74, %85 : f32
      %cst_49 = arith.constant 0.000000e+00 : f32
      %87 = arith.maximumf %86, %cst_49 : f32
      %cst_50 = arith.constant 9.99999993E-9 : f32
      %88 = arith.addf %83, %cst_50 : f32
      %89 = math.sqrt %88 : f32
      %cst_51 = arith.constant 9.99999993E-9 : f32
      %90 = arith.addf %87, %cst_51 : f32
      %91 = math.sqrt %90 : f32
      %92 = arith.mulf %89, %91 : f32
      %93 = arith.divf %79, %92 : f32
      %cst_52 = arith.constant -1.000000e+00 : f32
      %cst_53 = arith.constant 1.000000e+00 : f32
      %94 = arith.maximumf %cst_52, %93 : f32
      %95 = arith.minimumf %cst_53, %94 : f32
      %cst_54 = arith.constant 1.000000e+00 : f32
      %96 = arith.subf %cst_54, %95 : f32
      %c0_55 = arith.constant 0 : index
      %c0_56 = arith.constant 0 : index
      %97 = memref.load %arg3[%c0_55, %c0_56] : memref<1x1xf32, #tpu.memory_space<smem>>
      memref.store %96, %arg3[%c0_55, %c0_56] : memref<1x1xf32, #tpu.memory_space<smem>>
    } else {
    }
    return
  }
  func.func @transform_0(%arg0: i32) -> (i32, i32) {
    %c0_i32 = arith.constant 0 : i32
    %c0_i32_0 = arith.constant 0 : i32
    return %arg0, %c0_i32 : i32, i32
  }
  func.func @transform_1(%arg0: i32) -> (i32, i32) {
    %c0_i32 = arith.constant 0 : i32
    %c0_i32_0 = arith.constant 0 : i32
    return %arg0, %c0_i32 : i32, i32
  }
  func.func @transform_2(%arg0: i32) -> (i32, i32) {
    %c0_i32 = arith.constant 0 : i32
    %c0_i32_0 = arith.constant 0 : i32
    %c0_i32_1 = arith.constant 0 : i32
    return %c0_i32, %c0_i32_0 : i32, i32
  }
}

</mosaic_0001>

<bundles_post_ra>
// kernel: tpu_custom_call.1
= control target key start
LH: loop header
LB: loop body
LE: loop exit
PB: predicated region body
PF: predicated region fallthrough
CT: control target
= control target key end

     0   :  { %7 = vsyncpa [#allocation8], 0  ;;  %s319_s0 = inlined_call_operand.hbm [shape: f32[16,128], index: 0, kind: input, shape index: {}]   ;;  %s320_s1 = inlined_call_operand.hbm [shape: f32[16,128], index: 1, kind: input, shape index: {}]   ;;  %s321_s2 = inlined_call_operand.hbm [shape: f32[1,1], index: 2, kind: output, shape index: {}]  }
   0x1   :  { %8 = vsyncpa [#allocation11], 0 }
   0x2   :  { %9 = vsyncpa [#allocation9], 0  ;;  %s284_s9 = smov [#allocation7]  }
   0x3   :  { %s15_s10 = sshll.u32 %s284_s9, 4  ;;  %s16_s10 = int_to_ptr.vmem [resolvable:$true] %s15_s10 }
   0x4   :  { %s238_s11 = scalar_lea.vmem %s16_s10, 256  ;;  %p243_p1 = scmp.lt.s32.totalorder %s16_s10, %s16_s10 }
   0x5   :  { %p239_p0 = scmp.ne.s32.totalorder %s16_s10, %s238_s11  ;;  %p244_p2 = scmp.lt.s32.totalorder %s238_s11, %s238_s11 }
   0x7   :  { %p245_p3 = por %p244_p2, %p243_p1 }
   0x9   :  { %p246_p4 = pnand %p245_p3, %p239_p0 }
   0xb   :  { %249 = shalt.err (!%p246_p4)
}
   0xc   :  { %s285_s12 = smov 128   ;;  %s286_s13 = smov 8  }
   0xd   :  { %21 = dma.hbm_to_vmem [thread:$0]  %s319_s0, 256, %s16_s10, [#allocation8], %s285_s12, %s285_s12, %s286_s13  }
   0xe   :  { %s287_s16 = smov [#allocation10]  }
   0xf   :  { %s27_s17 = sshll.u32 %s287_s16, 4  ;;  %s28_s17 = int_to_ptr.vmem [resolvable:$true] %s27_s17 }
  0x10   :  { %s258_s18 = scalar_lea.vmem %s28_s17, 256  ;;  %p263_p6 = scmp.lt.s32.totalorder %s28_s17, %s28_s17 }
  0x11   :  { %p259_p5 = scmp.ne.s32.totalorder %s28_s17, %s258_s18  ;;  %p264_p7 = scmp.lt.s32.totalorder %s258_s18, %s258_s18 }
  0x13   :  { %p265_p8 = por %p264_p7, %p263_p6 }
  0x15   :  { %p266_p9 = pnand %p265_p8, %p259_p5 }
  0x17   :  { %269 = shalt.err (!%p266_p9)
}
  0x18   :  { %33 = dma.hbm_to_vmem [thread:$0]  %s320_s1, 256, %s28_s17, [#allocation11], %s285_s12, %s285_s12, %s286_s13  }
  0x19   :  { %278 = dma.done.wait [#allocation8], 256  }
  0x1a   :  { %279 = vsyncadd [#allocation8], 4294967040 }
  0x1b   :  { %280 = dma.done.wait [#allocation11], 256  }
  0x1c   :  { %281 = vsyncadd [#allocation11], 4294967040  ;;  %v49_v0 = vld [vmem:[#allocation7] sm:$0xff]  ;;  %v60_v1 = vld [vmem:[#allocation7 + $0x8] sm:$0xff]  ;;  %s288_s3 = smov 0.0   ;;  %s289_s16 = smov -1.0  }
  0x1d   :  { %v50_v2 = vld [vmem:[#allocation10] sm:$0xff]  ;;  %v63_v3 = vadd.f32 %v60_v1, %v49_v0  ;;  %v62_v5 = vld [vmem:[#allocation10 + $0x8] sm:$0xff]  ;;  %v55_v7 = vmul.f32 %v49_v0, %v49_v0  ;;  %v67_v8 = vmul.f32 %v60_v1, %v60_v1  ;;  %s290_s18 = smov 1.0  }
  0x1e   :  { %v53_v4 = vmul.f32 %v50_v2, %v49_v0  ;;  %v65_v6 = vmul.f32 %v62_v5, %v60_v1  ;;  %v64_v9 = vadd.f32 %v62_v5, %v50_v2  ;;  %v57_v10 = vmul.f32 %v50_v2, %v50_v2 }
  0x1f   :  { %90 = vadd.xlane.f32.xlu0 %v63_v3  ;;  %v69_v11 = vmul.f32 %v62_v5, %v62_v5  ;;  %v68_v13 = vadd.f32 %v67_v8, %v55_v7 }
  0x20   :  { %v66_v12 = vadd.f32 %v65_v6, %v53_v4 }
  0x21   :  { %v70_v14 = vadd.f32 %v69_v11, %v57_v10 }
  0x22   :  { %110 = vadd.xlane.f32.xlu1 %v66_v12 }
  0x23   :  { %100 = vadd.xlane.f32.xlu0 %v64_v9 }
  0x26   :  { %120 = vadd.xlane.f32.xlu1 %v68_v13 }
  0x27   :  { %130 = vadd.xlane.f32.xlu0 %v70_v14 }
  0xa8   :  { %v91_v15 = vpop.xlane.xlu0 %90 }
  0xa9   :  { %v92_v16 = vrot.slane %v91_v15, 4 }
  0xab   :  { %v93_v17 = vadd.f32 %v92_v16, %v91_v15  ;;  %v111_v18 = vpop.xlane.xlu1 %110 }
  0xac   :  { %v112_v19 = vrot.slane %v111_v18, 4  ;;  %v101_v20 = vpop.xlane.xlu0 %100 }
  0xad   :  { %v94_v21 = vrot.slane %v93_v17, 2  ;;  %v102_v22 = vrot.slane %v101_v20, 4 }
  0xae   :  { %v113_v23 = vadd.f32 %v112_v19, %v111_v18 }
  0xaf   :  { %v103_v24 = vadd.f32 %v102_v22, %v101_v20  ;;  %v121_v25 = vpop.xlane.xlu1 %120  ;;  %v95_v26 = vadd.f32 %v94_v21, %v93_v17 }
  0xb0   :  { %v114_v27 = vrot.slane %v113_v23, 2  ;;  %v122_v28 = vrot.slane %v121_v25, 4  ;;  %v131_v29 = vpop.xlane.xlu0 %130 }
  0xb1   :  { %v104_v30 = vrot.slane %v103_v24, 2  ;;  %v132_v31 = vrot.slane %v131_v29, 4  ;;  %v96_v32 = vrot.slane %v95_v26, 1 }
  0xb2   :  { %v123_v33 = vadd.f32 %v122_v28, %v121_v25  ;;  %v115_v34 = vadd.f32 %v114_v27, %v113_v23 }
  0xb3   :  { %v133_v35 = vadd.f32 %v132_v31, %v131_v29  ;;  %v97_v36 = vadd.f32 %v96_v32, %v95_v26  ;;  %v105_v37 = vadd.f32 %v104_v30, %v103_v24 }
  0xb4   :  { %v124_v38 = vrot.slane %v123_v33, 2  ;;  %v116_v39 = vrot.slane %v115_v34, 1 }
  0xb5   :  { %v134_v40 = vrot.slane %v133_v35, 2  ;;  %200 = vpush %v97_v36  ;;  %v106_v41 = vrot.slane %v105_v37, 1 }
  0xb6   :  { %v125_v42 = vadd.f32 %v124_v38, %v123_v33  ;;  %v117_v45 = vadd.f32 %v116_v39, %v115_v34 }
  0xb7   :  { %v135_v43 = vadd.f32 %v134_v40, %v133_v35  ;;  %v107_v44 = vadd.f32 %v106_v41, %v105_v37 }
  0xb8   :  { %v126_v46 = vrot.slane %v125_v42, 1 }
  0xb9   :  { %202 = vpush %v107_v44  ;;  %v136_v47 = vrot.slane %v135_v43, 1 }
  0xba   :  { %204 = vpush %v117_v45  ;;  %v127_v48 = vadd.f32 %v126_v46, %v125_v42 }
  0xbb   :  { %v137_v49 = vadd.f32 %v136_v47, %v135_v43 }
  0xbc   :  { %206 = vpush %v127_v48 }
  0xbd   :  { %208 = vpush %v137_v49 }
  0xe6   :  { %s201_s0 = spop %200 }
  0xe7   :  { %s141_s1 = smul.f32 0.00048828125, %s201_s0  ;;  %s291_s0 = smov [#allocation12]  }
  0xe9   :  { %s145_s21 = smul.f32 2048.0, %s141_s1 }
  0xea   :  { %s203_s22 = spop %202 }
  0xeb   :  { %s144_s23 = smul.f32 0.00048828125, %s203_s22  ;;  %s205_s24 = spop %204 }
  0xec   :  { %s148_s25 = smul.f32 %s145_s21, %s141_s1 }
  0xed   :  { %s146_s26 = smul.f32 %s145_s21, %s144_s23  ;;  %s207_s27 = spop %206 }
  0xee   :  { %s149_s28 = ssub.f32 %s207_s27, %s148_s25  ;;  %s151_s30 = smul.f32 2048.0, %s144_s23 }
  0xef   :  { %s313_s29 = ssub.f32 %s205_s24, %s146_s26  ;;  %s209_s7 = spop %208 }
  0xf0   :  { %s150_s4 = smax.f32 %s288_s3, %s149_s28  ;;  %s152_s6 = smul.f32 %s151_s30, %s144_s23 }
  0xf1   :  { %s155_s5 = sadd.f32 1e-08, %s150_s4 }
  0xf2   :  { %s153_s8 = ssub.f32 %s209_s7, %s152_s6 }
  0xf3   :  { %v156_v50 = vstv %s155_s5 }
  0xf4   :  { %224 = vrsqrt.f32 %v156_v50  ;;  %s154_s9 = smax.f32 %s288_s3, %s153_s8  ;;  %vm159_vm0 = vcmp.eq.f32.partialorder %v156_v50, inf  ;;  %v162_v54 = vand.u32 2147483648, %v156_v50  ;;  %vm161_vm1 = vcmp.eq.f32.partialorder %v156_v50, 0.0 }
  0xf5   :  { %s165_s10 = sadd.f32 1e-08, %s154_s9 }
  0xf7   :  { %v166_v51 = vstv %s165_s10 }
  0xf8   :  { %226 = vrsqrt.f32 %v166_v51  ;;  %vm169_vm2 = vcmp.eq.f32.partialorder %v166_v51, inf  ;;  %v172_v59 = vand.u32 2147483648, %v166_v51  ;;  %vm171_vm3 = vcmp.eq.f32.partialorder %v166_v51, 0.0 }
 0x101   :  { %v225_v52 = vpop.eup %224 }
 0x102   :  { %v158_v53 = vmul.f32 %v225_v52, %v156_v50 }
 0x104   :  { %v160_v55 = vsel %vm159_vm0, %v156_v50, %v158_v53 }
 0x105   :  { %v163_v56 = vsel %vm161_vm1, %v162_v54, %v160_v55  ;;  %v227_v57 = vpop.eup %226 }
 0x106   :  { %210 = vpush %v163_v56  ;;  %v168_v58 = vmul.f32 %v227_v57, %v166_v51 }
 0x108   :  { %v170_v60 = vsel %vm169_vm2, %v166_v51, %v168_v58 }
 0x109   :  { %v173_v61 = vsel %vm171_vm3, %v172_v59, %v170_v60 }
 0x10a   :  { %212 = vpush %v173_v61 }
 0x137   :  { %s211_s11 = spop %210 }
 0x13b   :  { %s213_s12 = spop %212 }
 0x13c   :  { %s175_s13 = smul.f32 %s213_s12, %s211_s11 }
 0x13e   :  { %v176_v62 = vstv %s175_s13 }
 0x13f   :  { %228 = vrcp.f32 %v176_v62 }
 0x14c   :  { %v229_v63 = vpop.eup %228 }
 0x14d   :  { %214 = vpush %v229_v63 }
 0x17e   :  { %s215_s14 = spop %214 }
 0x17f   :  { %s179_s15 = smul.f32 %s215_s14, %s313_s29 }
 0x181   :  { %s180_s17 = smax.f32 %s289_s16, %s179_s15 }
 0x182   :  { %s181_s19 = smin.f32 %s290_s18, %s180_s17 }
 0x183   :  { %s182_s20 = ssub.f32 1.0, %s181_s19 }
 0x185   :  { %184 = sst [smem:[#allocation12]] %s182_s20 }
 0x186   :  { %192 = dma.smem_to_hbm %s291_s0, 16, %s321_s2, [#allocation9]  }
 0x187   :  { %282 = dma.done.wait [#allocation9], 16  }
 0x188   :  { %283 = vsyncadd [#allocation9], 4294967280 }
 0x189   :  { %196 = sfence }
 0x18a   :  { %197 = vsyncpa [#allocation8], 1 }
 0x18b   :  { %198 = vsyncpa [#allocation11], 1 }
 0x18c   :  { %199 = vsyncpa [#allocation9], 1 }

</bundles_post_ra>
